<compile_context>
chip_gen: v6e
topology: v6e:2x2x1
jax: 0.10.0
libtpu: 0.0.40
codegen_flags: <defaults>
</compile_context>

<pallas_src>
import math

import jax
import jax.numpy as jnp
from jax.experimental import pallas as pl
from jax.experimental.pallas import tpu as pltpu

# ----------------------------- synthetic config -----------------------------
H = 32           # hidden size           (BERT-base: 768)
NH = 4           # attention heads       (BERT-base: 12)
DH = H // NH     # head dim
FF = 64          # FFN intermediate size (BERT-base: 3072)
L = 8            # text sequence length
V = 8            # number of panorama views
IMG_FEAT = 48    # args.image_feat_size
ANGLE_FEAT = 4   # args.angle_feat_size
VOCAB = 64
TYPE_VOCAB = 2
MAX_POS = 16
NUM_L_LAYERS = 2      # args.num_l_layers
NUM_PANO_LAYERS = 1   # args.num_pano_layers
FEAT_DROPOUT = 0.3    # args.feat_dropout  (VLNBert.drop_env)
LN_EPS = 1e-12
NEG_INF = -10000.0


# --------------------------- in-kernel helpers ---------------------------
def _ln(x, g, b):
    """LayerNorm over the last dim, f32 math. g/b are (1, N)."""
    mu = jnp.mean(x, axis=-1, keepdims=True)
    xc = x - mu
    var = jnp.mean(xc * xc, axis=-1, keepdims=True)
    return xc * jax.lax.rsqrt(var + LN_EPS) * g + b


# ------------------------------ Pallas kernels ------------------------------
def _layernorm_kernel(x_ref, g_ref, b_ref, o_ref):
    o_ref[...] = _ln(x_ref[...].astype(jnp.float32),
                     g_ref[...], b_ref[...]).astype(o_ref.dtype)


def _fused_layer_kernel(x_ref, bias_ref,
                        wqkv_ref, bqkv_ref, wo_ref, bo_ref,
                        ln1g_ref, ln1b_ref,
                        w1_ref, b1_ref, w2_ref, b2_ref,
                        ln2g_ref, ln2b_ref,
                        o_ref):
    """One full BERT self-attention layer for one batch element.

    x_ref:    (1, S, H)  activations (f32)
    bias_ref: (1, 1, S)  additive attention bias (0 for valid keys, -1e4 else)
    weights:  bf16 (matmul) / f32 (biases, LN params)
    """
    x = x_ref[0].astype(jnp.float32)            # (S, H)
    attn_bias = bias_ref[0].astype(jnp.float32)  # (1, S)

    # Fused QKV projection: one (S,H) x (H,3H) MXU matmul, bf16 in / f32 acc.
    qkv = jnp.dot(x.astype(jnp.bfloat16), wqkv_ref[...],
                  preferred_element_type=jnp.float32) + bqkv_ref[...]   # (S, 3H)

    scale = 1.0 / math.sqrt(DH)
    ctx_heads = []
    for h in range(NH):   # unrolled at trace time (NH is small)
        q = qkv[:, h * DH:(h + 1) * DH]                  # (S, DH)
        k = qkv[:, H + h * DH:H + (h + 1) * DH]          # (S, DH)
        v = qkv[:, 2 * H + h * DH:2 * H + (h + 1) * DH]  # (S, DH)
        s = jax.lax.dot_general(q, k, (((1,), (1,)), ((), ())),
                                preferred_element_type=jnp.float32)     # (S, S)
        s = s * scale + attn_bias                        # key-side mask only
        s = s - jnp.max(s, axis=-1, keepdims=True)
        e = jnp.exp(s)
        p = e / jnp.sum(e, axis=-1, keepdims=True)
        ctx_heads.append(
            jnp.dot(p.astype(jnp.bfloat16), v.astype(jnp.bfloat16),
                    preferred_element_type=jnp.float32))                # (S, DH)
    ctx = jnp.concatenate(ctx_heads, axis=-1)            # (S, H)

    attn_out = jnp.dot(ctx.astype(jnp.bfloat16), wo_ref[...],
                       preferred_element_type=jnp.float32) + bo_ref[...]
    h1 = _ln(attn_out + x, ln1g_ref[...], ln1b_ref[...])

    ff = jnp.dot(h1.astype(jnp.bfloat16), w1_ref[...],
                 preferred_element_type=jnp.float32) + b1_ref[...]
    # TODO(synk): BERT uses exact erf-GELU; tanh-approx GELU is used for EUP lowering.
    ff = jax.nn.gelu(ff, approximate=True)
    ff2 = jnp.dot(ff.astype(jnp.bfloat16), w2_ref[...],
                  preferred_element_type=jnp.float32) + b2_ref[...]
    out = _ln(ff2 + h1, ln2g_ref[...], ln2b_ref[...])

    o_ref[0] = out.astype(o_ref.dtype)


def _pano_embed_kernel(view_ref, drop_ref, loc_ref, nte_ref,
                       imgw_ref, imgb_ref, imgg_ref, imgbeta_ref,
                       locw_ref, locb_ref, locg_ref, locbeta_ref,
                       panog_ref, panobeta_ref, o_ref):
    """Fused panorama embedding:
    LN(LN(drop(view) @ Wimg + b) + LN(loc @ Wloc + b) + nav/type embeddings)."""
    # Feature dropout (VLNBert.drop_env) fused in: drop_ref holds keep/(1-p).
    v = view_ref[...].astype(jnp.float32) * drop_ref[...]
    img = jnp.dot(v.astype(jnp.bfloat16), imgw_ref[...],
                  preferred_element_type=jnp.float32) + imgb_ref[...]
    img = _ln(img, imgg_ref[...], imgbeta_ref[...])

    loc = jnp.dot(loc_ref[...].astype(jnp.bfloat16), locw_ref[...],
                  preferred_element_type=jnp.float32) + locb_ref[...]
    loc = _ln(loc, locg_ref[...], locbeta_ref[...])

    emb = img + loc + nte_ref[...].astype(jnp.float32)
    o_ref[...] = _ln(emb, panog_ref[...], panobeta_ref[...]).astype(o_ref.dtype)


# ------------------------------ kernel wrappers ------------------------------
def _const_spec(a):
    """Full-array block, same block for every grid step (no re-DMA)."""
    nd = a.ndim
    return pl.BlockSpec(a.shape, lambda *_: (0,) * nd)


def pallas_layernorm(x, gamma, beta):
    M, N = x.shape
    return pl.pallas_call(
        _layernorm_kernel,
        out_shape=jax.ShapeDtypeStruct((M, N), jnp.float32),
        grid=(1,),
        in_specs=[pl.BlockSpec((M, N), lambda i: (0, 0)),
                  pl.BlockSpec((1, N), lambda i: (0, 0)),
                  pl.BlockSpec((1, N), lambda i: (0, 0))],
        out_specs=pl.BlockSpec((M, N), lambda i: (0, 0)),
    )(x, gamma, beta)


def fused_transformer_layer(x, attn_bias, lp):
    """x: (B, S, H) f32; attn_bias: (B, 1, S) f32; lp: layer param dict."""
    B, S, Hh = x.shape
    return pl.pallas_call(
        _fused_layer_kernel,
        out_shape=jax.ShapeDtypeStruct((B, S, Hh), jnp.float32),
        grid=(B,),
        in_specs=[pl.BlockSpec((1, S, Hh), lambda b: (b, 0, 0)),
                  pl.BlockSpec((1, 1, S), lambda b: (b, 0, 0)),
                  _const_spec(lp['wqkv']), _const_spec(lp['bqkv']),
                  _const_spec(lp['wo']), _const_spec(lp['bo']),
                  _const_spec(lp['ln1_g']), _const_spec(lp['ln1_b']),
                  _const_spec(lp['w1']), _const_spec(lp['b1']),
                  _const_spec(lp['w2']), _const_spec(lp['b2']),
                  _const_spec(lp['ln2_g']), _const_spec(lp['ln2_b'])],
        out_specs=pl.BlockSpec((1, S, Hh), lambda b: (b, 0, 0)),
        compiler_params=pltpu.CompilerParams(dimension_semantics=("parallel",)),
    )(x, attn_bias,
      lp['wqkv'], lp['bqkv'], lp['wo'], lp['bo'],
      lp['ln1_g'], lp['ln1_b'],
      lp['w1'], lp['b1'], lp['w2'], lp['b2'],
      lp['ln2_g'], lp['ln2_b'])


def pallas_pano_embed(view, drop_scale, loc, nte, params):
    M = view.shape[0]
    return pl.pallas_call(
        _pano_embed_kernel,
        out_shape=jax.ShapeDtypeStruct((M, H), jnp.float32),
        grid=(1,),
        in_specs=[_const_spec(view), _const_spec(drop_scale),
                  _const_spec(loc), _const_spec(nte),
                  _const_spec(params['img_w']), _const_spec(params['img_b']),
                  _const_spec(params['img_ln_g']), _const_spec(params['img_ln_b']),
                  _const_spec(params['loc_w']), _const_spec(params['loc_b']),
                  _const_spec(params['loc_ln_g']), _const_spec(params['loc_ln_b']),
                  _const_spec(params['pano_ln_g']), _const_spec(params['pano_ln_b'])],
        out_specs=pl.BlockSpec((M, H), lambda i: (0, 0)),
    )(view, drop_scale, loc, nte,
      params['img_w'], params['img_b'], params['img_ln_g'], params['img_ln_b'],
      params['loc_w'], params['loc_b'], params['loc_ln_g'], params['loc_ln_b'],
      params['pano_ln_g'], params['pano_ln_b'])


# ------------------------------ model glue ------------------------------
def init_params(key):
    it = iter(jax.random.split(key, 64))

    def nrm(shape, dtype=jnp.float32):
        return (jax.random.normal(next(it), shape, jnp.float32) * 0.02).astype(dtype)

    ones = jnp.ones((1, H), jnp.float32)
    zeros_h = jnp.zeros((1, H), jnp.float32)

    def layer():
        return {
            # matmul weights in bf16 (native MXU path, half the DMA bytes)
            'wqkv': nrm((H, 3 * H), jnp.bfloat16),
            'bqkv': jnp.zeros((1, 3 * H), jnp.float32),
            'wo': nrm((H, H), jnp.bfloat16), 'bo': zeros_h,
            'ln1_g': ones, 'ln1_b': zeros_h,
            'w1': nrm((H, FF), jnp.bfloat16), 'b1': jnp.zeros((1, FF), jnp.float32),
            'w2': nrm((FF, H), jnp.bfloat16), 'b2': zeros_h,
            'ln2_g': ones, 'ln2_b': zeros_h,
        }

    return {
        # language (text) embeddings + encoder
        'word_emb': nrm((VOCAB, H)),
        'pos_emb': nrm((MAX_POS, H)),
        'type_emb': nrm((TYPE_VOCAB, H)),
        'emb_ln_g': ones, 'emb_ln_b': zeros_h,
        'l_layers': [layer() for _ in range(NUM_L_LAYERS)],
        # panorama (image) embeddings + encoder
        'img_w': nrm((IMG_FEAT, H), jnp.bfloat16), 'img_b': zeros_h,
        'img_ln_g': ones, 'img_ln_b': zeros_h,
        'loc_w': nrm((ANGLE_FEAT, H), jnp.bfloat16), 'loc_b': zeros_h,
        'loc_ln_g': ones, 'loc_ln_b': zeros_h,
        'nav_type_emb': nrm((3, H)),
        'pano_ln_g': ones, 'pano_ln_b': zeros_h,
        'pano_layers': [layer() for _ in range(NUM_PANO_LAYERS)],
    }


def _attn_bias(mask):
    """(B, S) bool/int mask (1 = valid key) -> (B, 1, S) additive bias."""
    B, S = mask.shape
    return ((1.0 - mask.astype(jnp.float32)) * NEG_INF).reshape(B, 1, S)


def language_forward(params, batch):
    txt_ids = batch['txt_ids']                       # (B, L) int32
    txt_masks = batch['txt_masks']                   # (B, L) bool
    B, S = txt_ids.shape
    we = jnp.take(params['word_emb'], txt_ids, axis=0)          # (B, L, H) gather (XLA)
    pe = params['pos_emb'][:S][None, :, :]
    te = params['type_emb'][0][None, None, :]
    emb = (we + pe + te).reshape(B * S, H)
    x = pallas_layernorm(emb, params['emb_ln_g'], params['emb_ln_b']).reshape(B, S, H)
    bias = _attn_bias(txt_masks)
    for lp in params['l_layers']:
        x = fused_transformer_layer(x, bias, lp)
    return x


def panorama_forward(params, batch, feat_dropout, rng, training=True):
    view = batch['view_img_fts']                     # (B, V, IMG_FEAT)
    loc = batch['loc_fts']                           # (B, V, ANGLE_FEAT)
    nav_types = batch['nav_types']                   # (B, V) int32
    pano_masks = batch['pano_masks']                 # (B, V) bool
    B, Vn, _ = view.shape

    view2 = view.reshape(B * Vn, IMG_FEAT)
    if training and feat_dropout > 0.0 and rng is not None:
        keep = jax.random.bernoulli(rng, 1.0 - feat_dropout, view2.shape)
        drop_scale = keep.astype(jnp.float32) * (1.0 / (1.0 - feat_dropout))
    else:
        drop_scale = jnp.ones((B * Vn, IMG_FEAT), jnp.float32)

    nte = (jnp.take(params['nav_type_emb'], nav_types.reshape(-1), axis=0)
           + params['type_emb'][1][None, :])                    # (B*V, H)

    emb = pallas_pano_embed(view2, drop_scale,
                            loc.reshape(B * Vn, ANGLE_FEAT), nte, params)
    x = emb.reshape(B, Vn, H)
    bias = _attn_bias(pano_masks)
    for lp in params['pano_layers']:
        x = fused_transformer_layer(x, bias, lp)

    pano_embeds = x
    # TODO(synk): rec_pano_embeds (room-type dreamer reconstruction branch) of
    # GlocalTextPathNavCMT is not specified in the provided source; returning the
    # encoder output as a stand-in.
    rec_pano_embeds = x
    return pano_embeds, rec_pano_embeds, pano_masks, pano_masks


class VLNBertPallas:
    """Pallas re-implementation of VLNBert.forward for 'language'/'panorama' modes."""

    def __init__(self, params, feat_dropout=FEAT_DROPOUT, rng=None):
        self.params = params
        self.feat_dropout = feat_dropout
        self._rng = rng if rng is not None else jax.random.PRNGKey(0)

    def __call__(self, mode, batch, training=True):
        if mode == 'language':
            return language_forward(self.params, batch)
        elif mode == 'panorama':
            # fresh dropout key per call (i.i.d. dropout masks across calls)
            self._rng, sub = jax.random.split(self._rng)
            return panorama_forward(self.params, batch, self.feat_dropout,
                                    sub, training=training)
        else:
            # TODO(synk): navigation* modes require the full cross-modal graph
            # (global/local branch fusion) of GlocalTextPathNavCMT, whose source
            # is not provided.
            raise NotImplementedError('wrong mode: %s' % mode)


# ------------------------------ demo / smoke test ------------------------------
if __name__ == "__main__":
    key = jax.random.PRNGKey(0)
    pkey, dkey = jax.random.split(key)
    params = init_params(pkey)
    model = VLNBertPallas(params, feat_dropout=FEAT_DROPOUT,
                          rng=jax.random.PRNGKey(42))

    ks = jax.random.split(dkey, 4)
    B = 2
    txt_ids = jax.random.randint(ks[0], (B, L), 0, VOCAB, dtype=jnp.int32)
    txt_masks = jnp.arange(L)[None, :] < jnp.array([L, 5])[:, None]

    view_img_fts = jax.random.normal(ks[1], (B, V, IMG_FEAT), jnp.float32)
    loc_fts = jax.random.normal(ks[2], (B, V, ANGLE_FEAT), jnp.float32)
    nav_types = jnp.ones((B, V), jnp.int32)
    pano_masks = jnp.arange(V)[None, :] < jnp.array([V, 6])[:, None]

    txt_embeds = model('language', {'txt_ids': txt_ids, 'txt_masks': txt_masks})
    txt_embeds = jax.block_until_ready(txt_embeds)

    pano_embeds, rec_pano_embeds, pm, rpm = model('panorama', {
        'view_img_fts': view_img_fts,
        'loc_fts': loc_fts,
        'nav_types': nav_types,
        'pano_masks': pano_masks,
    })
    jax.block_until_ready((pano_embeds, rec_pano_embeds, pm, rpm))

    assert txt_embeds.shape == (B, L, H)
    assert pano_embeds.shape == (B, V, H)
    assert rec_pano_embeds.shape == (B, V, H)
    assert pm.shape == (B, V)
    assert bool(jnp.all(jnp.isfinite(txt_embeds)))
    assert bool(jnp.all(jnp.isfinite(pano_embeds)))
    print("KERNEL_OK")
</pallas_src>

<mosaic_0001>
module attributes {stable_mosaic.version = 11 : i64} {
  func.func @_layernorm_kernel(%arg0: i32, %arg1: memref<16x32xf32, #tpu.memory_space<vmem>>, %arg2: memref<1x32xf32, #tpu.memory_space<vmem>>, %arg3: memref<1x32xf32, #tpu.memory_space<vmem>>, %arg4: memref<16x32xf32, #tpu.memory_space<vmem>>) attributes {dimension_semantics = [#tpu.dimension_semantics<arbitrary>], iteration_bounds = array<i64: 1>, scalar_prefetch = 0 : i64, scratch_operands = 0 : i64, tpu.core_type = #tpu.core_type<tc>, window_params = [{pipeline_mode = #tpu.pipeline_mode<synchronous>, transform_indices = @transform_0, window_bounds = array<i64: 16, 32>}, {pipeline_mode = #tpu.pipeline_mode<synchronous>, transform_indices = @transform_1, window_bounds = array<i64: 1, 32>}, {pipeline_mode = #tpu.pipeline_mode<synchronous>, transform_indices = @transform_2, window_bounds = array<i64: 1, 32>}, {pipeline_mode = #tpu.pipeline_mode<synchronous>, transform_indices = @transform_3, window_bounds = array<i64: 16, 32>}]} {
    %c0 = arith.constant 0 : index
    %c0_0 = arith.constant 0 : index
    %0 = vector.load %arg1[%c0, %c0_0] : memref<16x32xf32, #tpu.memory_space<vmem>>, vector<16x32xf32>
    %c0_1 = arith.constant 0 : index
    %c0_2 = arith.constant 0 : index
    %1 = vector.load %arg2[%c0_1, %c0_2] : memref<1x32xf32, #tpu.memory_space<vmem>>, vector<1x32xf32>
    %c0_3 = arith.constant 0 : index
    %c0_4 = arith.constant 0 : index
    %2 = vector.load %arg3[%c0_3, %c0_4] : memref<1x32xf32, #tpu.memory_space<vmem>>, vector<1x32xf32>
    %cst = arith.constant dense<0.000000e+00> : vector<16xf32>
    %3 = vector.multi_reduction <add>, %0, %cst [1] : vector<16x32xf32> to vector<16xf32>
    %4 = vector.shape_cast %3 : vector<16xf32> to vector<16x1xf32>
    %cst_5 = arith.constant 3.200000e+01 : f32
    %5 = vector.broadcast %cst_5 : f32 to vector<16x1xf32>
    %6 = arith.divf %4, %5 : vector<16x1xf32>
    %7 = vector.broadcast %6 : vector<16x1xf32> to vector<16x32xf32>
    %8 = arith.subf %0, %7 : vector<16x32xf32>
    %9 = arith.mulf %8, %8 : vector<16x32xf32>
    %cst_6 = arith.constant dense<0.000000e+00> : vector<16xf32>
    %10 = vector.multi_reduction <add>, %9, %cst_6 [1] : vector<16x32xf32> to vector<16xf32>
    %11 = vector.shape_cast %10 : vector<16xf32> to vector<16x1xf32>
    %cst_7 = arith.constant 3.200000e+01 : f32
    %12 = vector.broadcast %cst_7 : f32 to vector<16x1xf32>
    %13 = arith.divf %11, %12 : vector<16x1xf32>
    %cst_8 = arith.constant 9.99999996E-13 : f32
    %14 = vector.broadcast %cst_8 : f32 to vector<16x1xf32>
    %15 = arith.addf %13, %14 : vector<16x1xf32>
    %16 = math.rsqrt %15 : vector<16x1xf32>
    %17 = vector.broadcast %16 : vector<16x1xf32> to vector<16x32xf32>
    %18 = arith.mulf %8, %17 : vector<16x32xf32>
    %19 = vector.broadcast %1 : vector<1x32xf32> to vector<16x32xf32>
    %20 = arith.mulf %18, %19 : vector<16x32xf32>
    %21 = vector.broadcast %2 : vector<1x32xf32> to vector<16x32xf32>
    %22 = arith.addf %20, %21 : vector<16x32xf32>
    %c0_9 = arith.constant 0 : index
    %c0_10 = arith.constant 0 : index
    %23 = vector.load %arg4[%c0_9, %c0_10] : memref<16x32xf32, #tpu.memory_space<vmem>>, vector<16x32xf32>
    tpu.vector_store %arg4[%c0_9, %c0_10], %22 {strides = array<i32>} : memref<16x32xf32, #tpu.memory_space<vmem>>, vector<16x32xf32>,
    return
  }
  func.func @transform_0(%arg0: i32) -> (i32, i32) {
    %c0_i32 = arith.constant 0 : i32
    %c0_i32_0 = arith.constant 0 : i32
    %c0_i32_1 = arith.constant 0 : i32
    return %c0_i32, %c0_i32_0 : i32, i32
  }
  func.func @transform_1(%arg0: i32) -> (i32, i32) {
    %c0_i32 = arith.constant 0 : i32
    %c0_i32_0 = arith.constant 0 : i32
    %c0_i32_1 = arith.constant 0 : i32
    return %c0_i32, %c0_i32_0 : i32, i32
  }
  func.func @transform_2(%arg0: i32) -> (i32, i32) {
    %c0_i32 = arith.constant 0 : i32
    %c0_i32_0 = arith.constant 0 : i32
    %c0_i32_1 = arith.constant 0 : i32
    return %c0_i32, %c0_i32_0 : i32, i32
  }
  func.func @transform_3(%arg0: i32) -> (i32, i32) {
    %c0_i32 = arith.constant 0 : i32
    %c0_i32_0 = arith.constant 0 : i32
    %c0_i32_1 = arith.constant 0 : i32
    return %c0_i32, %c0_i32_0 : i32, i32
  }
}

</mosaic_0001>

<bundles_post_ra>
// kernel: tpu_custom_call.1
= control target key start
LH: loop header
LB: loop body
LE: loop exit
PB: predicated region body
PF: predicated region fallthrough
CT: control target
= control target key end

     0   :  { %8 = vsyncpa [#allocation3], 0  ;;  %s198_s0 = inlined_call_operand.hbm [shape: f32[16,32], index: 0, kind: input, shape index: {}]   ;;  %s199_s1 = inlined_call_operand.vmem [shape: f32[1,32], index: 1, kind: input, shape index: {}]   ;;  %s200_s2 = inlined_call_operand.vmem [shape: f32[1,32], index: 2, kind: input, shape index: {}]   ;;  %s201_s3 = inlined_call_operand.hbm [shape: f32[16,32], index: 3, kind: output, shape index: {}]  }
   0x1   :  { %9 = vsyncpa [#allocation4], 0  ;;  %s150_s12 = smov [#allocation2]  }
   0x2   :  { %s15_s13 = sshll.u32 %s150_s12, 4  ;;  %s16_s13 = int_to_ptr.vmem [resolvable:$true] %s15_s13 }
   0x3   :  { %s114_s14 = scalar_lea.vmem %s16_s13, 256  ;;  %p119_p1 = scmp.lt.s32.totalorder %s16_s13, %s16_s13 }
   0x4   :  { %p115_p0 = scmp.ne.s32.totalorder %s16_s13, %s114_s14  ;;  %p120_p2 = scmp.lt.s32.totalorder %s114_s14, %s114_s14 }
   0x6   :  { %p121_p3 = por %p120_p2, %p119_p1 }
   0x8   :  { %p122_p4 = pnand %p121_p3, %p115_p0 }
   0xa   :  { %125 = shalt.err (!%p122_p4)
}
   0xb   :  { %s151_s15 = smov 128   ;;  %s152_s16 = smov 8  }
   0xc   :  { %21 = dma.hbm_to_vmem [thread:$0]  %s198_s0, 256, %s16_s13, [#allocation3], %s151_s15, %s151_s15, %s152_s16  }
   0xd   :  { %146 = dma.done.wait [#allocation3], 256  }
   0xe   :  { %147 = vsyncadd [#allocation3], 4294967040  ;;  %vm33_vm0 = vcmask 261120   ;;  %v29_v0 = vld [vmem:[#allocation2] sm:$0xff]  ;;  %v30_v1 = vld [vmem:[#allocation2 + $0x8] sm:$0xff]  ;;  %s153_s22 = smov [#allocation5]  }
   0xf   :  { %v34_v2 = vsel %vm33_vm0, %v29_v0, 0.0  ;;  %v37_v3 = vsel %vm33_vm0, %v30_v1, 0.0  ;;  %v96_v21 = vld [vmem:[%s199_s1] ss:$0 sm:$0xff]  ;;  %s84_s23 = sshll.u32 %s153_s22, 4  ;;  %s85_s23 = int_to_ptr.vmem [resolvable:$true] %s84_s23 }
  0x10   :  { %35 = vadd.xlane.f32.xlu0 %v34_v2  ;;  %v97_v23 = vld [vmem:[%s200_s2] ss:$0 sm:$0xff]  ;;  %s126_s24 = scalar_lea.vmem %s85_s23, 256  ;;  %p131_p6 = scmp.lt.s32.totalorder %s85_s23, %s85_s23 }
  0x11   :  { %p127_p5 = scmp.ne.s32.totalorder %s85_s23, %s126_s24  ;;  %p132_p7 = scmp.lt.s32.totalorder %s126_s24, %s126_s24 }
  0x13   :  { %p133_p8 = por %p132_p7, %p131_p6 }
  0x14   :  { %38 = vadd.xlane.f32.xlu0 %v37_v3 }
  0x15   :  { %p134_p9 = pnand %p133_p8, %p127_p5 }
  0x99   :  { %v36_v4 = vpop.xlane.xlu0 %35 }
  0x9a   :  { %v41_v5 = vmul.f32 0.03125, %v36_v4 }
  0x9c   :  { %v43_v6 = vsub.f32 %v29_v0, %v41_v5 }
  0x9d   :  { %v39_v7 = vpop.xlane.xlu0 %38 }
  0x9e   :  { %v42_v8 = vmul.f32 0.03125, %v39_v7  ;;  %v45_v9 = vmul.f32 %v43_v6, %v43_v6 }
  0xa0   :  { %v44_v10 = vsub.f32 %v30_v1, %v42_v8  ;;  %v47_v11 = vsel %vm33_vm0, %v45_v9, 0.0 }
  0xa1   :  { %48 = vadd.xlane.f32.xlu1 %v47_v11 }
  0xa2   :  { %v46_v12 = vmul.f32 %v44_v10, %v44_v10 }
  0xa4   :  { %v50_v13 = vsel %vm33_vm0, %v46_v12, 0.0 }
  0xa5   :  { %51 = vadd.xlane.f32.xlu1 %v50_v13 }
 0x12a   :  { %v49_v14 = vpop.xlane.xlu1 %48 }
 0x12b   :  { %v53_v15 = vmul.f32 0.03125, %v49_v14 }
 0x12d   :  { %v55_v16 = vadd.f32 1e-12, %v53_v15 }
 0x12e   :  { %v52_v17 = vpop.xlane.xlu1 %51 }
 0x12f   :  { %102 = vrsqrt.f32 %v55_v16  ;;  %v54_v18 = vmul.f32 0.03125, %v52_v17 }
 0x131   :  { %v56_v19 = vadd.f32 1e-12, %v54_v18 }
 0x133   :  { %104 = vrsqrt.f32 %v56_v19 }
 0x13c   :  { %v103_v20 = vpop.eup %102 }
 0x13d   :  { %v59_v22 = vmul.f32 %v103_v20, %v43_v6 }
 0x13f   :  { %v67_v24 = vmul.f32 %v96_v21, %v59_v22 }
 0x140   :  { %v105_v25 = vpop.eup %104 }
 0x141   :  { %v60_v26 = vmul.f32 %v105_v25, %v44_v10  ;;  %v75_v27 = vadd.f32 %v97_v23, %v67_v24 }
 0x143   :  { %v68_v28 = vmul.f32 %v96_v21, %v60_v26  ;;  %77 = vst.msk [vmem:[#allocation5] sm:$0xff] %vm33_vm0, %v75_v27 }
 0x145   :  { %v76_v29 = vadd.f32 %v97_v23, %v68_v28 }
 0x147   :  { %78 = vst.msk [vmem:[#allocation5 + $0x8] sm:$0xff] %vm33_vm0, %v76_v29 }
 0x148   :  { %137 = shalt.err (!%p134_p9)
}
 0x149   :  { %90 = dma.vmem_to_hbm [thread:$0]  %s85_s23, 256, %s201_s3, [#allocation4], %s151_s15, %s151_s15, %s152_s16  }
 0x14a   :  { %148 = dma.done.wait [#allocation4], 256  }
 0x14b   :  { %149 = vsyncadd [#allocation4], 4294967040 }
 0x14c   :  { %94 = vsyncpa [#allocation3], 1 }
 0x14d   :  { %95 = vsyncpa [#allocation4], 1 }

</bundles_post_ra>
